<compile_context>
chip_gen: v6e
topology: v6e:2x2x1
jax: 0.10.0
libtpu: 0.0.40
codegen_flags: <defaults>
</compile_context>

<pallas_src>
import math
import functools

import jax
import jax.numpy as jnp
import numpy as np
from jax.experimental import pallas as pl
from jax.experimental.pallas import tpu as pltpu

# ----------------------------- configuration --------------------------------
HDIM = 32          # C
NHEADS = 4         # heads (head_dim = 8)
SEQ = 8            # T
BN = 2             # B*N (flattened batch of the module)
LN_EPS = 1e-5
NEG_INF = -1e30


# ------------------------------- kernel -------------------------------------
def phrase_context_kernel(x_ref, mask_ref, wqkv_ref, wout_ref, wfc_ref, aux_ref,
                          o_ref, *, nheads):
    t, c = x_ref.shape
    hd = c // nheads

    x = x_ref[...]                                       # [T, C]

    # Aux slab layout: row0 = b_qkv; row1 = [b_out | b_fc | 0]; rows 2..5 = LN params.
    b_qkv = aux_ref[0:1, :]                              # [1, 3C]
    b_out = aux_ref[1:2, 0:c]                            # [1, C]
    b_fc = aux_ref[1:2, c:2 * c]                         # [1, C]
    ln1_g, ln1_b = aux_ref[2:3, 0:c], aux_ref[3:4, 0:c]
    ln2_g, ln2_b = aux_ref[4:5, 0:c], aux_ref[5:6, 0:c]

    # Fused, pre-composed QKV projection (softmax scale folded into Q): one MXU pass.
    qkv = jnp.dot(x, wqkv_ref[...], preferred_element_type=jnp.float32) + b_qkv

    # Key-padding bias built in-kernel from the [1, 1, T] mask block.
    key_bias = jnp.where(mask_ref[0] > 0.0, 0.0, NEG_INF).astype(jnp.float32)  # [1, T]

    def layernorm(z, g, b):
        mu = jnp.mean(z, axis=-1, keepdims=True)
        var = jnp.mean((z - mu) ** 2, axis=-1, keepdims=True)
        return (z - mu) * jax.lax.rsqrt(var + LN_EPS) * g + b

    nt_dims = (((1,), (1,)), ((), ()))                   # q @ k^T, transpose-free

    # Per-head attention; contexts stay in vregs (no VMEM scratch, no strip stores),
    # softmax normalization applied after P@V on the [T, hd] result.
    ctx_parts = []
    for h in range(nheads):
        qh = qkv[:, h * hd:(h + 1) * hd]
        kh = qkv[:, c + h * hd:c + (h + 1) * hd]
        vh = qkv[:, 2 * c + h * hd:2 * c + (h + 1) * hd]

        s = jax.lax.dot_general(qh, kh, nt_dims,
                                preferred_element_type=jnp.float32) + key_bias
        s = s - jnp.max(s, axis=-1, keepdims=True)
        p = jnp.exp(s)
        denom = jnp.sum(p, axis=-1, keepdims=True)       # [T, 1]
        ctx_h = jnp.dot(p, vh, preferred_element_type=jnp.float32)
        ctx_parts.append(ctx_h * (1.0 / denom))          # exact divide: 8 values/head
    ctx = jnp.concatenate(ctx_parts, axis=-1)            # [T, C], one register concat

    # MHA out_proj -> residual + LayerNorm (dropout is identity in eval mode).
    update = jnp.dot(ctx, wout_ref[...], preferred_element_type=jnp.float32) + b_out
    x1 = layernorm(x + update, ln1_g, ln1_b)

    # fc_t (Linear + ReLU) -> residual + LayerNorm.
    t_up = jnp.maximum(
        jnp.dot(x1, wfc_ref[...], preferred_element_type=jnp.float32) + b_fc, 0.0)
    o_ref[...] = layernorm(x1 + t_up, ln2_g, ln2_b)


# --------------------------- parameter composition ---------------------------
def _compose_params(params):
    """Pre-transpose all weights to [in, out], fold the q/k/v outer projections into
    the MHA in_proj, fold the softmax scale into Q, fuse QKV into one matrix and pack
    every small vector into a single (8, 3C) aux slab."""
    c = params["q_w"].shape[0]
    hd = c // NHEADS
    scale = 1.0 / math.sqrt(hd)

    wq, wk, wv = params["q_w"].T, params["k_w"].T, params["v_w"].T
    wiq, wik, wiv = [w.T for w in jnp.split(params["in_w"], 3, axis=0)]
    biq, bik, biv = jnp.split(params["in_b"], 3)

    wq_c = (wq @ wiq) * scale
    bq_c = (params["q_b"] @ wiq + biq) * scale
    wk_c = wk @ wik
    bk_c = params["k_b"] @ wik + bik
    wv_c = wv @ wiv
    bv_c = params["v_b"] @ wiv + biv

    w_qkv = jnp.concatenate([wq_c, wk_c, wv_c], axis=1)            # [C, 3C]
    w_out = params["out_w"].T                                      # [C, C]
    w_fc = params["fc_w"].T                                        # [C, C]

    aux = jnp.zeros((8, 3 * c), jnp.float32)
    aux = aux.at[0, :].set(jnp.concatenate([bq_c, bk_c, bv_c]))
    aux = aux.at[1, 0:c].set(params["out_b"])
    aux = aux.at[1, c:2 * c].set(params["fc_b"])
    aux = aux.at[2, 0:c].set(params["ln1_g"])
    aux = aux.at[3, 0:c].set(params["ln1_b"])
    aux = aux.at[4, 0:c].set(params["ln2_g"])
    aux = aux.at[5, 0:c].set(params["ln2_b"])
    return w_qkv, w_out, w_fc, aux


# ------------------------------- wrapper -------------------------------------
def phrase_context_layer(context_emb, phrase_emb, vid_mask, params):
    """context_emb: [BN, T, C] f32; vid_mask: [BN, T] (nonzero = valid key).
    phrase_emb is unused by the PyTorch forward and is ignored here."""
    del phrase_emb
    bn, t, c = context_emb.shape
    hd = c // NHEADS
    w_qkv, w_out, w_fc, aux = _compose_params(params)

    x_flat = context_emb.reshape(bn * t, c)                 # free leading-dim flatten
    mask3 = vid_mask.reshape(bn, 1, t).astype(jnp.float32)  # tiny per-batch key mask

    flops = int(bn * (2 * t * c * (3 * c)                   # fused qkv projection
                      + NHEADS * 2 * (2 * t * t * hd)       # scores + p@v per head
                      + 2 * (2 * t * c * c)))               # out_proj + fc_t
    transcendentals = int(bn * (NHEADS * t * t + 2 * t))
    bytes_accessed = int(4 * (2 * x_flat.size + mask3.size + w_qkv.size
                              + w_out.size + w_fc.size + aux.size))

    kernel = functools.partial(phrase_context_kernel, nheads=NHEADS)
    out_flat = pl.pallas_call(
        kernel,
        grid=(bn,),
        out_shape=jax.ShapeDtypeStruct((bn * t, c), jnp.float32),
        in_specs=[
            pl.BlockSpec((t, c), lambda b: (b, 0)),          # x tile of this batch elem
            pl.BlockSpec((1, 1, t), lambda b: (b, 0, 0)),    # vid_mask row
            pl.BlockSpec((c, 3 * c), lambda b: (0, 0)),      # resident weights
            pl.BlockSpec((c, c), lambda b: (0, 0)),
            pl.BlockSpec((c, c), lambda b: (0, 0)),
            pl.BlockSpec((8, 3 * c), lambda b: (0, 0)),      # aux slab (one tile)
        ],
        out_specs=pl.BlockSpec((t, c), lambda b: (b, 0)),
        compiler_params=pltpu.CompilerParams(
            dimension_semantics=("parallel",)),
        cost_estimate=pl.CostEstimate(flops=flops,
                                      transcendentals=transcendentals,
                                      bytes_accessed=bytes_accessed),
    )(x_flat, mask3, w_qkv, w_out, w_fc, aux)
    return out_flat.reshape(bn, t, c)


# --------------------------- pure-JAX reference ------------------------------
def reference(context_emb, vid_mask, params):
    c = context_emb.shape[-1]
    hd = c // NHEADS
    scale = 1.0 / math.sqrt(hd)

    def lin(z, w, b):
        return z @ w.T + b

    def layernorm(z, g, b):
        mu = jnp.mean(z, axis=-1, keepdims=True)
        var = jnp.mean((z - mu) ** 2, axis=-1, keepdims=True)
        return (z - mu) * jax.lax.rsqrt(var + LN_EPS) * g + b

    x = context_emb
    q = lin(x, params["q_w"], params["q_b"])
    k = lin(x, params["k_w"], params["k_b"])
    v = lin(x, params["v_w"], params["v_b"])
    wiq, wik, wiv = jnp.split(params["in_w"], 3, axis=0)
    biq, bik, biv = jnp.split(params["in_b"], 3)
    q2, k2, v2 = lin(q, wiq, biq), lin(k, wik, bik), lin(v, wiv, biv)

    bn, t, _ = x.shape
    qh = q2.reshape(bn, t, NHEADS, hd).transpose(0, 2, 1, 3) * scale
    kh = k2.reshape(bn, t, NHEADS, hd).transpose(0, 2, 1, 3)
    vh = v2.reshape(bn, t, NHEADS, hd).transpose(0, 2, 1, 3)
    s = jnp.einsum("bhqd,bhkd->bhqk", qh, kh)
    bias = jnp.where(vid_mask[:, None, None, :] > 0, 0.0, NEG_INF)
    p = jax.nn.softmax(s + bias, axis=-1)
    ctx = jnp.einsum("bhqk,bhkd->bhqd", p, vh).transpose(0, 2, 1, 3).reshape(bn, t, c)

    x1 = layernorm(x + lin(ctx, params["out_w"], params["out_b"]),
                   params["ln1_g"], params["ln1_b"])
    t_up = jnp.maximum(lin(x1, params["fc_w"], params["fc_b"]), 0.0)
    return layernorm(x1 + t_up, params["ln2_g"], params["ln2_b"])


# --------------------------------- main --------------------------------------
if __name__ == "__main__":
    key = jax.random.PRNGKey(0)
    ks = jax.random.split(key, 18)

    def w(k, shape, s):
        return jax.random.normal(k, shape, jnp.float32) * s

    params = {
        "q_w": w(ks[0], (HDIM, HDIM), 0.1), "q_b": w(ks[1], (HDIM,), 0.01),
        "k_w": w(ks[2], (HDIM, HDIM), 0.1), "k_b": w(ks[3], (HDIM,), 0.01),
        "v_w": w(ks[4], (HDIM, HDIM), 0.1), "v_b": w(ks[5], (HDIM,), 0.01),
        "in_w": w(ks[6], (3 * HDIM, HDIM), 0.1), "in_b": w(ks[7], (3 * HDIM,), 0.01),
        "out_w": w(ks[8], (HDIM, HDIM), 0.1), "out_b": w(ks[9], (HDIM,), 0.01),
        "fc_w": w(ks[10], (HDIM, HDIM), 0.1), "fc_b": w(ks[11], (HDIM,), 0.01),
        "ln1_g": 1.0 + w(ks[12], (HDIM,), 0.05), "ln1_b": w(ks[13], (HDIM,), 0.01),
        "ln2_g": 1.0 + w(ks[14], (HDIM,), 0.05), "ln2_b": w(ks[15], (HDIM,), 0.01),
    }

    context_emb = jax.random.normal(ks[16], (BN, SEQ, HDIM), jnp.float32)
    phrase_emb = jax.random.normal(ks[17], (BN, SEQ, HDIM), jnp.float32)  # unused by fwd
    vid_mask = jnp.ones((BN, SEQ), jnp.float32).at[0, SEQ - 2:].set(0.0)

    out = phrase_context_layer(context_emb, phrase_emb, vid_mask, params)
    out = jax.block_until_ready(out)

    ref = reference(context_emb, vid_mask, params)
    np.testing.assert_allclose(np.asarray(out), np.asarray(ref),
                               rtol=2e-4, atol=2e-4)
    print("KERNEL_OK")
</pallas_src>

<mosaic_0001>
module attributes {stable_mosaic.version = 11 : i64} {
  func.func @phrase_context_kernel(%arg0: i32, %arg1: memref<8x32xf32, #tpu.memory_space<vmem>>, %arg2: memref<1x1x8xf32, #tpu.memory_space<vmem>>, %arg3: memref<32x96xf32, #tpu.memory_space<vmem>>, %arg4: memref<32x32xf32, #tpu.memory_space<vmem>>, %arg5: memref<32x32xf32, #tpu.memory_space<vmem>>, %arg6: memref<8x96xf32, #tpu.memory_space<vmem>>, %arg7: memref<8x32xf32, #tpu.memory_space<vmem>>) attributes {dimension_semantics = [#tpu.dimension_semantics<parallel>], iteration_bounds = array<i64: 2>, scalar_prefetch = 0 : i64, scratch_operands = 0 : i64, tpu.core_type = #tpu.core_type<tc>, window_params = [{transform_indices = @transform_0, window_bounds = array<i64: 8, 32>}, {transform_indices = @transform_1, window_bounds = array<i64: 1, 1, 8>}, {pipeline_mode = #tpu.pipeline_mode<synchronous>, transform_indices = @transform_2, window_bounds = array<i64: 32, 96>}, {pipeline_mode = #tpu.pipeline_mode<synchronous>, transform_indices = @transform_3, window_bounds = array<i64: 32, 32>}, {pipeline_mode = #tpu.pipeline_mode<synchronous>, transform_indices = @transform_4, window_bounds = array<i64: 32, 32>}, {pipeline_mode = #tpu.pipeline_mode<synchronous>, transform_indices = @transform_5, window_bounds = array<i64: 8, 96>}, {transform_indices = @transform_6, window_bounds = array<i64: 8, 32>}]} {
    %c0 = arith.constant 0 : index
    %c0_0 = arith.constant 0 : index
    %0 = vector.load %arg1[%c0, %c0_0] : memref<8x32xf32, #tpu.memory_space<vmem>>, vector<8x32xf32>
    %c0_1 = arith.constant 0 : index
    %c0_2 = arith.constant 0 : index
    %1 = vector.load %arg6[%c0_1, %c0_2] : memref<8x96xf32, #tpu.memory_space<vmem>>, vector<1x96xf32>
    %c1 = arith.constant 1 : index
    %c0_3 = arith.constant 0 : index
    %2 = vector.load %arg6[%c1, %c0_3] : memref<8x96xf32, #tpu.memory_space<vmem>>, vector<1x32xf32>
    %c1_4 = arith.constant 1 : index
    %c32 = arith.constant 32 : index
    %3 = vector.load %arg6[%c1_4, %c32] : memref<8x96xf32, #tpu.memory_space<vmem>>, vector<1x32xf32>
    %c2 = arith.constant 2 : index
    %c0_5 = arith.constant 0 : index
    %4 = vector.load %arg6[%c2, %c0_5] : memref<8x96xf32, #tpu.memory_space<vmem>>, vector<1x32xf32>
    %c3 = arith.constant 3 : index
    %c0_6 = arith.constant 0 : index
    %5 = vector.load %arg6[%c3, %c0_6] : memref<8x96xf32, #tpu.memory_space<vmem>>, vector<1x32xf32>
    %c4 = arith.constant 4 : index
    %c0_7 = arith.constant 0 : index
    %6 = vector.load %arg6[%c4, %c0_7] : memref<8x96xf32, #tpu.memory_space<vmem>>, vector<1x32xf32>
    %c5 = arith.constant 5 : index
    %c0_8 = arith.constant 0 : index
    %7 = vector.load %arg6[%c5, %c0_8] : memref<8x96xf32, #tpu.memory_space<vmem>>, vector<1x32xf32>
    %c0_9 = arith.constant 0 : index
    %c0_10 = arith.constant 0 : index
    %8 = vector.load %arg3[%c0_9, %c0_10] : memref<32x96xf32, #tpu.memory_space<vmem>>, vector<32x96xf32>
    %cst = arith.constant dense<0.000000e+00> : vector<8x96xf32>
    %9 = tpu.matmul %0, %8, %cst {dimension_numbers = #tpu.dot_dimension_numbers<[1], [0], [0], [1], [0, 0, 1, 1], [], []>} : vector<8x32xf32>, vector<32x96xf32>, vector<8x96xf32> -> vector<8x96xf32>
    %10 = vector.broadcast %1 : vector<1x96xf32> to vector<8x96xf32>
    %11 = arith.addf %9, %10 : vector<8x96xf32>
    %c0_11 = arith.constant 0 : index
    %c0_12 = arith.constant 0 : index
    %c0_13 = arith.constant 0 : index
    %12 = vector.load %arg2[%c0_11, %c0_12, %c0_13] : memref<1x1x8xf32, #tpu.memory_space<vmem>>, vector<1x1x8xf32>
    %13 = vector.shape_cast %12 : vector<1x1x8xf32> to vector<1x8xf32>
    %cst_14 = arith.constant 0.000000e+00 : f32
    %14 = vector.broadcast %cst_14 : f32 to vector<1x8xf32>
    %15 = arith.cmpf ogt, %13, %14 : vector<1x8xf32>
    %cst_15 = arith.constant 0.000000e+00 : f32
    %cst_16 = arith.constant -1.000000e+30 : f32
    %16 = vector.broadcast %cst_15 : f32 to vector<1x8xf32>
    %17 = vector.broadcast %cst_16 : f32 to vector<1x8xf32>
    %18 = arith.select %15, %16, %17 : vector<1x8xi1>, vector<1x8xf32>
    %19 = vector.extract_strided_slice %11 {offsets = [0, 0], sizes = [8, 8], strides = [1, 1]} : vector<8x96xf32> to vector<8x8xf32>
    %20 = vector.extract_strided_slice %11 {offsets = [0, 32], sizes = [8, 8], strides = [1, 1]} : vector<8x96xf32> to vector<8x8xf32>
    %21 = vector.extract_strided_slice %11 {offsets = [0, 64], sizes = [8, 8], strides = [1, 1]} : vector<8x96xf32> to vector<8x8xf32>
    %cst_17 = arith.constant dense<0.000000e+00> : vector<8x8xf32>
    %22 = tpu.matmul %19, %20, %cst_17 {dimension_numbers = #tpu.dot_dimension_numbers<[1], [1], [0], [0], [0, 0, 1, 0], [], []>} : vector<8x8xf32>, vector<8x8xf32>, vector<8x8xf32> -> vector<8x8xf32>
    %23 = vector.broadcast %18 : vector<1x8xf32> to vector<8x8xf32>
    %24 = arith.addf %22, %23 : vector<8x8xf32>
    %cst_18 = arith.constant dense<0xFF800000> : vector<8xf32>
    %25 = vector.multi_reduction <maximumf>, %24, %cst_18 [1] : vector<8x8xf32> to vector<8xf32>
    %26 = vector.shape_cast %25 : vector<8xf32> to vector<8x1xf32>
    %27 = vector.broadcast %26 : vector<8x1xf32> to vector<8x8xf32>
    %28 = arith.subf %24, %27 : vector<8x8xf32>
    %29 = math.exp %28 : vector<8x8xf32>
    %cst_19 = arith.constant dense<0.000000e+00> : vector<8xf32>
    %30 = vector.multi_reduction <add>, %29, %cst_19 [1] : vector<8x8xf32> to vector<8xf32>
    %31 = vector.shape_cast %30 : vector<8xf32> to vector<8x1xf32>
    %cst_20 = arith.constant dense<0.000000e+00> : vector<8x8xf32>
    %32 = tpu.matmul %29, %21, %cst_20 {dimension_numbers = #tpu.dot_dimension_numbers<[1], [0], [0], [1], [0, 0, 1, 1], [], []>} : vector<8x8xf32>, vector<8x8xf32>, vector<8x8xf32> -> vector<8x8xf32>
    %cst_21 = arith.constant 1.000000e+00 : f32
    %33 = vector.broadcast %cst_21 : f32 to vector<8x1xf32>
    %34 = arith.divf %33, %31 : vector<8x1xf32>
    %35 = vector.broadcast %34 : vector<8x1xf32> to vector<8x8xf32>
    %36 = arith.mulf %32, %35 : vector<8x8xf32>
    %37 = vector.extract_strided_slice %11 {offsets = [0, 8], sizes = [8, 8], strides = [1, 1]} : vector<8x96xf32> to vector<8x8xf32>
    %38 = vector.extract_strided_slice %11 {offsets = [0, 40], sizes = [8, 8], strides = [1, 1]} : vector<8x96xf32> to vector<8x8xf32>
    %39 = vector.extract_strided_slice %11 {offsets = [0, 72], sizes = [8, 8], strides = [1, 1]} : vector<8x96xf32> to vector<8x8xf32>
    %cst_22 = arith.constant dense<0.000000e+00> : vector<8x8xf32>
    %40 = tpu.matmul %37, %38, %cst_22 {dimension_numbers = #tpu.dot_dimension_numbers<[1], [1], [0], [0], [0, 0, 1, 0], [], []>} : vector<8x8xf32>, vector<8x8xf32>, vector<8x8xf32> -> vector<8x8xf32>
    %41 = vector.broadcast %18 : vector<1x8xf32> to vector<8x8xf32>
    %42 = arith.addf %40, %41 : vector<8x8xf32>
    %cst_23 = arith.constant dense<0xFF800000> : vector<8xf32>
    %43 = vector.multi_reduction <maximumf>, %42, %cst_23 [1] : vector<8x8xf32> to vector<8xf32>
    %44 = vector.shape_cast %43 : vector<8xf32> to vector<8x1xf32>
    %45 = vector.broadcast %44 : vector<8x1xf32> to vector<8x8xf32>
    %46 = arith.subf %42, %45 : vector<8x8xf32>
    %47 = math.exp %46 : vector<8x8xf32>
    %cst_24 = arith.constant dense<0.000000e+00> : vector<8xf32>
    %48 = vector.multi_reduction <add>, %47, %cst_24 [1] : vector<8x8xf32> to vector<8xf32>
    %49 = vector.shape_cast %48 : vector<8xf32> to vector<8x1xf32>
    %cst_25 = arith.constant dense<0.000000e+00> : vector<8x8xf32>
    %50 = tpu.matmul %47, %39, %cst_25 {dimension_numbers = #tpu.dot_dimension_numbers<[1], [0], [0], [1], [0, 0, 1, 1], [], []>} : vector<8x8xf32>, vector<8x8xf32>, vector<8x8xf32> -> vector<8x8xf32>
    %cst_26 = arith.constant 1.000000e+00 : f32
    %51 = vector.broadcast %cst_26 : f32 to vector<8x1xf32>
    %52 = arith.divf %51, %49 : vector<8x1xf32>
    %53 = vector.broadcast %52 : vector<8x1xf32> to vector<8x8xf32>
    %54 = arith.mulf %50, %53 : vector<8x8xf32>
    %55 = vector.extract_strided_slice %11 {offsets = [0, 16], sizes = [8, 8], strides = [1, 1]} : vector<8x96xf32> to vector<8x8xf32>
    %56 = vector.extract_strided_slice %11 {offsets = [0, 48], sizes = [8, 8], strides = [1, 1]} : vector<8x96xf32> to vector<8x8xf32>
    %57 = vector.extract_strided_slice %11 {offsets = [0, 80], sizes = [8, 8], strides = [1, 1]} : vector<8x96xf32> to vector<8x8xf32>
    %cst_27 = arith.constant dense<0.000000e+00> : vector<8x8xf32>
    %58 = tpu.matmul %55, %56, %cst_27 {dimension_numbers = #tpu.dot_dimension_numbers<[1], [1], [0], [0], [0, 0, 1, 0], [], []>} : vector<8x8xf32>, vector<8x8xf32>, vector<8x8xf32> -> vector<8x8xf32>
    %59 = vector.broadcast %18 : vector<1x8xf32> to vector<8x8xf32>
    %60 = arith.addf %58, %59 : vector<8x8xf32>
    %cst_28 = arith.constant dense<0xFF800000> : vector<8xf32>
    %61 = vector.multi_reduction <maximumf>, %60, %cst_28 [1] : vector<8x8xf32> to vector<8xf32>
    %62 = vector.shape_cast %61 : vector<8xf32> to vector<8x1xf32>
    %63 = vector.broadcast %62 : vector<8x1xf32> to vector<8x8xf32>
    %64 = arith.subf %60, %63 : vector<8x8xf32>
    %65 = math.exp %64 : vector<8x8xf32>
    %cst_29 = arith.constant dense<0.000000e+00> : vector<8xf32>
    %66 = vector.multi_reduction <add>, %65, %cst_29 [1] : vector<8x8xf32> to vector<8xf32>
    %67 = vector.shape_cast %66 : vector<8xf32> to vector<8x1xf32>
    %cst_30 = arith.constant dense<0.000000e+00> : vector<8x8xf32>
    %68 = tpu.matmul %65, %57, %cst_30 {dimension_numbers = #tpu.dot_dimension_numbers<[1], [0], [0], [1], [0, 0, 1, 1], [], []>} : vector<8x8xf32>, vector<8x8xf32>, vector<8x8xf32> -> vector<8x8xf32>
    %cst_31 = arith.constant 1.000000e+00 : f32
    %69 = vector.broadcast %cst_31 : f32 to vector<8x1xf32>
    %70 = arith.divf %69, %67 : vector<8x1xf32>
    %71 = vector.broadcast %70 : vector<8x1xf32> to vector<8x8xf32>
    %72 = arith.mulf %68, %71 : vector<8x8xf32>
    %73 = vector.extract_strided_slice %11 {offsets = [0, 24], sizes = [8, 8], strides = [1, 1]} : vector<8x96xf32> to vector<8x8xf32>
    %74 = vector.extract_strided_slice %11 {offsets = [0, 56], sizes = [8, 8], strides = [1, 1]} : vector<8x96xf32> to vector<8x8xf32>
    %75 = vector.extract_strided_slice %11 {offsets = [0, 88], sizes = [8, 8], strides = [1, 1]} : vector<8x96xf32> to vector<8x8xf32>
    %cst_32 = arith.constant dense<0.000000e+00> : vector<8x8xf32>
    %76 = tpu.matmul %73, %74, %cst_32 {dimension_numbers = #tpu.dot_dimension_numbers<[1], [1], [0], [0], [0, 0, 1, 0], [], []>} : vector<8x8xf32>, vector<8x8xf32>, vector<8x8xf32> -> vector<8x8xf32>
    %77 = vector.broadcast %18 : vector<1x8xf32> to vector<8x8xf32>
    %78 = arith.addf %76, %77 : vector<8x8xf32>
    %cst_33 = arith.constant dense<0xFF800000> : vector<8xf32>
    %79 = vector.multi_reduction <maximumf>, %78, %cst_33 [1] : vector<8x8xf32> to vector<8xf32>
    %80 = vector.shape_cast %79 : vector<8xf32> to vector<8x1xf32>
    %81 = vector.broadcast %80 : vector<8x1xf32> to vector<8x8xf32>
    %82 = arith.subf %78, %81 : vector<8x8xf32>
    %83 = math.exp %82 : vector<8x8xf32>
    %cst_34 = arith.constant dense<0.000000e+00> : vector<8xf32>
    %84 = vector.multi_reduction <add>, %83, %cst_34 [1] : vector<8x8xf32> to vector<8xf32>
    %85 = vector.shape_cast %84 : vector<8xf32> to vector<8x1xf32>
    %cst_35 = arith.constant dense<0.000000e+00> : vector<8x8xf32>
    %86 = tpu.matmul %83, %75, %cst_35 {dimension_numbers = #tpu.dot_dimension_numbers<[1], [0], [0], [1], [0, 0, 1, 1], [], []>} : vector<8x8xf32>, vector<8x8xf32>, vector<8x8xf32> -> vector<8x8xf32>
    %cst_36 = arith.constant 1.000000e+00 : f32
    %87 = vector.broadcast %cst_36 : f32 to vector<8x1xf32>
    %88 = arith.divf %87, %85 : vector<8x1xf32>
    %89 = vector.broadcast %88 : vector<8x1xf32> to vector<8x8xf32>
    %90 = arith.mulf %86, %89 : vector<8x8xf32>
    %91 = tpu.concatenate %36, %54, %72, %90 in 1 : vector<8x8xf32>, vector<8x8xf32>, vector<8x8xf32>, vector<8x8xf32> -> vector<8x32xf32>
    %c0_37 = arith.constant 0 : index
    %c0_38 = arith.constant 0 : index
    %92 = vector.load %arg4[%c0_37, %c0_38] : memref<32x32xf32, #tpu.memory_space<vmem>>, vector<32x32xf32>
    %cst_39 = arith.constant dense<0.000000e+00> : vector<8x32xf32>
    %93 = tpu.matmul %91, %92, %cst_39 {dimension_numbers = #tpu.dot_dimension_numbers<[1], [0], [0], [1], [0, 0, 1, 1], [], []>} : vector<8x32xf32>, vector<32x32xf32>, vector<8x32xf32> -> vector<8x32xf32>
    %94 = vector.broadcast %2 : vector<1x32xf32> to vector<8x32xf32>
    %95 = arith.addf %93, %94 : vector<8x32xf32>
    %96 = arith.addf %0, %95 : vector<8x32xf32>
    %cst_40 = arith.constant dense<0.000000e+00> : vector<8xf32>
    %97 = vector.multi_reduction <add>, %96, %cst_40 [1] : vector<8x32xf32> to vector<8xf32>
    %98 = vector.shape_cast %97 : vector<8xf32> to vector<8x1xf32>
    %cst_41 = arith.constant 3.200000e+01 : f32
    %99 = vector.broadcast %cst_41 : f32 to vector<8x1xf32>
    %100 = arith.divf %98, %99 : vector<8x1xf32>
    %101 = vector.broadcast %100 : vector<8x1xf32> to vector<8x32xf32>
    %102 = arith.subf %96, %101 : vector<8x32xf32>
    %103 = arith.mulf %102, %102 : vector<8x32xf32>
    %cst_42 = arith.constant dense<0.000000e+00> : vector<8xf32>
    %104 = vector.multi_reduction <add>, %103, %cst_42 [1] : vector<8x32xf32> to vector<8xf32>
    %105 = vector.shape_cast %104 : vector<8xf32> to vector<8x1xf32>
    %cst_43 = arith.constant 3.200000e+01 : f32
    %106 = vector.broadcast %cst_43 : f32 to vector<8x1xf32>
    %107 = arith.divf %105, %106 : vector<8x1xf32>
    %108 = vector.broadcast %100 : vector<8x1xf32> to vector<8x32xf32>
    %109 = arith.subf %96, %108 : vector<8x32xf32>
    %cst_44 = arith.constant 9.99999974E-6 : f32
    %110 = vector.broadcast %cst_44 : f32 to vector<8x1xf32>
    %111 = arith.addf %107, %110 : vector<8x1xf32>
    %112 = math.rsqrt %111 : vector<8x1xf32>
    %113 = vector.broadcast %112 : vector<8x1xf32> to vector<8x32xf32>
    %114 = arith.mulf %109, %113 : vector<8x32xf32>
    %115 = vector.broadcast %4 : vector<1x32xf32> to vector<8x32xf32>
    %116 = arith.mulf %114, %115 : vector<8x32xf32>
    %117 = vector.broadcast %5 : vector<1x32xf32> to vector<8x32xf32>
    %118 = arith.addf %116, %117 : vector<8x32xf32>
    %c0_45 = arith.constant 0 : index
    %c0_46 = arith.constant 0 : index
    %119 = vector.load %arg5[%c0_45, %c0_46] : memref<32x32xf32, #tpu.memory_space<vmem>>, vector<32x32xf32>
    %cst_47 = arith.constant dense<0.000000e+00> : vector<8x32xf32>
    %120 = tpu.matmul %118, %119, %cst_47 {dimension_numbers = #tpu.dot_dimension_numbers<[1], [0], [0], [1], [0, 0, 1, 1], [], []>} : vector<8x32xf32>, vector<32x32xf32>, vector<8x32xf32> -> vector<8x32xf32>
    %121 = vector.broadcast %3 : vector<1x32xf32> to vector<8x32xf32>
    %122 = arith.addf %120, %121 : vector<8x32xf32>
    %cst_48 = arith.constant 0.000000e+00 : f32
    %123 = vector.broadcast %cst_48 : f32 to vector<8x32xf32>
    %124 = arith.maximumf %122, %123 : vector<8x32xf32>
    %125 = arith.addf %118, %124 : vector<8x32xf32>
    %cst_49 = arith.constant dense<0.000000e+00> : vector<8xf32>
    %126 = vector.multi_reduction <add>, %125, %cst_49 [1] : vector<8x32xf32> to vector<8xf32>
    %127 = vector.shape_cast %126 : vector<8xf32> to vector<8x1xf32>
    %cst_50 = arith.constant 3.200000e+01 : f32
    %128 = vector.broadcast %cst_50 : f32 to vector<8x1xf32>
    %129 = arith.divf %127, %128 : vector<8x1xf32>
    %130 = vector.broadcast %129 : vector<8x1xf32> to vector<8x32xf32>
    %131 = arith.subf %125, %130 : vector<8x32xf32>
    %132 = arith.mulf %131, %131 : vector<8x32xf32>
    %cst_51 = arith.constant dense<0.000000e+00> : vector<8xf32>
    %133 = vector.multi_reduction <add>, %132, %cst_51 [1] : vector<8x32xf32> to vector<8xf32>
    %134 = vector.shape_cast %133 : vector<8xf32> to vector<8x1xf32>
    %cst_52 = arith.constant 3.200000e+01 : f32
    %135 = vector.broadcast %cst_52 : f32 to vector<8x1xf32>
    %136 = arith.divf %134, %135 : vector<8x1xf32>
    %137 = vector.broadcast %129 : vector<8x1xf32> to vector<8x32xf32>
    %138 = arith.subf %125, %137 : vector<8x32xf32>
    %cst_53 = arith.constant 9.99999974E-6 : f32
    %139 = vector.broadcast %cst_53 : f32 to vector<8x1xf32>
    %140 = arith.addf %136, %139 : vector<8x1xf32>
    %141 = math.rsqrt %140 : vector<8x1xf32>
    %142 = vector.broadcast %141 : vector<8x1xf32> to vector<8x32xf32>
    %143 = arith.mulf %138, %142 : vector<8x32xf32>
    %144 = vector.broadcast %6 : vector<1x32xf32> to vector<8x32xf32>
    %145 = arith.mulf %143, %144 : vector<8x32xf32>
    %146 = vector.broadcast %7 : vector<1x32xf32> to vector<8x32xf32>
    %147 = arith.addf %145, %146 : vector<8x32xf32>
    %c0_54 = arith.constant 0 : index
    %c0_55 = arith.constant 0 : index
    %148 = vector.load %arg7[%c0_54, %c0_55] : memref<8x32xf32, #tpu.memory_space<vmem>>, vector<8x32xf32>
    tpu.vector_store %arg7[%c0_54, %c0_55], %147 {strides = array<i32>} : memref<8x32xf32, #tpu.memory_space<vmem>>, vector<8x32xf32>,
    return
  }
  func.func @transform_0(%arg0: i32) -> (i32, i32) {
    %c0_i32 = arith.constant 0 : i32
    %c0_i32_0 = arith.constant 0 : i32
    return %arg0, %c0_i32 : i32, i32
  }
  func.func @transform_1(%arg0: i32) -> (i32, i32, i32) {
    %c0_i32 = arith.constant 0 : i32
    %c0_i32_0 = arith.constant 0 : i32
    %c0_i32_1 = arith.constant 0 : i32
    return %arg0, %c0_i32, %c0_i32_0 : i32, i32, i32
  }
  func.func @transform_2(%arg0: i32) -> (i32, i32) {
    %c0_i32 = arith.constant 0 : i32
    %c0_i32_0 = arith.constant 0 : i32
    %c0_i32_1 = arith.constant 0 : i32
    return %c0_i32, %c0_i32_0 : i32, i32
  }
  func.func @transform_3(%arg0: i32) -> (i32, i32) {
    %c0_i32 = arith.constant 0 : i32
    %c0_i32_0 = arith.constant 0 : i32
    %c0_i32_1 = arith.constant 0 : i32
    return %c0_i32, %c0_i32_0 : i32, i32
  }
  func.func @transform_4(%arg0: i32) -> (i32, i32) {
    %c0_i32 = arith.constant 0 : i32
    %c0_i32_0 = arith.constant 0 : i32
    %c0_i32_1 = arith.constant 0 : i32
    return %c0_i32, %c0_i32_0 : i32, i32
  }
  func.func @transform_5(%arg0: i32) -> (i32, i32) {
    %c0_i32 = arith.constant 0 : i32
    %c0_i32_0 = arith.constant 0 : i32
    %c0_i32_1 = arith.constant 0 : i32
    return %c0_i32, %c0_i32_0 : i32, i32
  }
  func.func @transform_6(%arg0: i32) -> (i32, i32) {
    %c0_i32 = arith.constant 0 : i32
    %c0_i32_0 = arith.constant 0 : i32
    return %arg0, %c0_i32 : i32, i32
  }
}

</mosaic_0001>

<bundles_post_ra>
// kernel: tpu_custom_call.1
= control target key start
LH: loop header
LB: loop body
LE: loop exit
PB: predicated region body
PF: predicated region fallthrough
CT: control target
= control target key end

     0   :  { %s2341_s0 = inlined_call_operand.hbm [shape: f32[16,32], index: 0, kind: input, shape index: {}]   ;;  %s2342_s1 = inlined_call_operand.hbm [shape: f32[2,1,8], index: 1, kind: input, shape index: {}]   ;;  %s2343_s2 = inlined_call_operand.hbm [shape: f32[32,96], index: 2, kind: input, shape index: {}]   ;;  %s2344_s3 = inlined_call_operand.hbm [shape: f32[32,32], index: 3, kind: input, shape index: {}]   ;;  %s2345_s4 = inlined_call_operand.hbm [shape: f32[32,32], index: 4, kind: input, shape index: {}]   ;;  %s2346_s5 = inlined_call_operand.vmem [shape: f32[8,96], index: 5, kind: input, shape index: {}]   ;;  %s2347_s6 = inlined_call_operand.hbm [shape: f32[16,32], index: 6, kind: output, shape index: {}]  }
   0x1   :  { %2352 = sst [smem:[#allocation17_spill]] %s2343_s2 }
   0x2   :  { %11 = vsyncpa [#allocation3], 0 }
   0x3   :  { %13 = vsyncpa [#allocation3 + $0x1], 0 }
   0x4   :  { %14 = vsyncpa [#allocation6], 0 }
   0x5   :  { %16 = vsyncpa [#allocation6 + $0x1], 0 }
   0x6   :  { %17 = vsyncpa [#allocation9], 0 }
   0x7   :  { %18 = vsyncpa [#allocation4], 0 }
   0x8   :  { %20 = vsyncpa [#allocation4 + $0x1], 0  ;;  %s2005_s21 = smov 0   ;;  %s2007_s22 = smov 0  }
   0x9   :  { %s2009_s23 = smov 0   ;;  %s2011_s24 = smov 0  }
   0xa LB: > { %s2026_s25 = sadd.s32 4294967295, %s1943_s24   ;;  %s1468_s26 = sadd.s32 4294967294, %s1943_s24   ;;  %s1943_s24 = sphi %s2011_s24, %s2374_s24   ;;  %s1939_s23 = sphi %s2009_s23, %s2373_s23   ;;  %s1935_s22 = sphi %s2007_s22, %s2372_s22   ;;  %s1931_s21 = sphi %s2005_s21, %s2371_s21  }
   0xb   : > { %p46_p0 = scmp.ne.s32.totalorder %s1935_s22, %s1931_s21  ;;  %p2348_p1 = scmp.eq.s32.totalorder %s2026_s25, 0 }
   0xc   : > { %p186_p3 = scmp.eq.s32.totalorder %s1468_s26, 1  ;;  %p1469_p5 = scmp.ge.s32.totalorder %s1943_s24, 1 }
   0xd   : > { %p2035_p4 = por %p2348_p1, %p46_p0  ;;  %p193_p7 = scmp.lt.s32.totalorder %s1943_s24, 3 }
   0xe   : > { %p2040_p6 = por %p186_p3, %p46_p0  ;;  %s1945_s30 = smov [#allocation7]  }
   0xf   : > { %s2353_s27 = scalar_select %p2035_p4, 1, 0 }
  0x10   : > { %s2354_s28 = scalar_select %p2040_p6, 1, 0 }
  0x11   : > { %p2045_p8 = pnand %p1469_p5, %p193_p7  ;;  %s205_s7 = sshll.u32 %s1945_s30, 4  ;;  %s206_s7 = int_to_ptr.vmem [resolvable:$true] %s205_s7 }
  0x12   : > { %s1946_s9 = smov [#allocation8]   ;;  %s1947_s11 = smov [#allocation10]  }
  0x13   : > { %s2355_s29 = scalar_select %p2045_p8, 1, 0 }
  0x14   : > { %p1630_p9 = pneg %p2045_p8  ;;  %s218_s10 = sshll.u32 %s1946_s9, 4  ;;  %s219_s10 = int_to_ptr.vmem [resolvable:$true] %s218_s10 }
  0x15   : > { %s231_s12 = sshll.u32 %s1947_s11, 4  ;;  %s1744_s13 = scalar_lea.vmem %s206_s7, 512  ;;  %s232_s12 = int_to_ptr.vmem [resolvable:$true] %s231_s12 }
  0x16   : > { %p2054_p11 = pnand %p1630_p9, %p2348_p1  ;;  %p1745_p13 = scmp.ne.s32.totalorder %s206_s7, %s1744_s13 }
  0x17   : > { %p1752_p5 = scmp.lt.s32.totalorder %s206_s7, %s206_s7  ;;  %p1753_p7 = scmp.lt.s32.totalorder %s1744_s13, %s1744_s13 }
  0x18   : > { %p1735_p12 = pneg %p2054_p11 }
  0x19   : > { %p1754_p9 = por %p1753_p7, %p1752_p5 }
  0x1a   : > { %p1747_p0 = pnand %p1745_p13, %p1735_p12 }
  0x1c   : > { %p1748_p3 = pneg %p1747_p0 }
  0x1e   : > { %p1755_p10 = pnand %p1754_p9, %p1748_p3 }
  0x20   : > { %1758 = shalt.err (!%p1755_p10)
}
  0x21   : > { %s1948_s14 = smov 128   ;;  %s1949_s15 = smov 8  }
  0x22   : > { %s2357_s2 = sld [smem:[#allocation17_spill]]  ;;  %s1770_s18 = scalar_lea.vmem %s219_s10, 512 }
  0x23   : > { %p1771_p1 = scmp.ne.s32.totalorder %s219_s10, %s1770_s18  ;;  %p1778_p2 = scmp.lt.s32.totalorder %s219_s10, %s219_s10 }
  0x24   : > { %p1779_p6 = scmp.lt.s32.totalorder %s1770_s18, %s1770_s18 }
  0x25   : > { %p1773_p13 = pnand %p1771_p1, %p1735_p12 }
  0x26   : > { %p1780_p5 = por %p1779_p6, %p1778_p2 }
  0x27   : > { %p1774_p0 = pneg %p1773_p13 }
  0x28   : > { %1633 = dma.hbm_to_vmem [thread:$0]  (!%p2054_p11), %s2357_s2, 512, %s206_s7, [#allocation6], %s1948_s14, %s1948_s14, %s1949_s15  }
  0x29   : > { %p1781_p3 = pnand %p1780_p5, %p1774_p0 }
  0x2b   : > { %1784 = shalt.err (!%p1781_p3)
}
  0x2c   : > { %1636 = dma.hbm_to_vmem [thread:$0]  (!%p2054_p11), %s2344_s3, 512, %s219_s10, [#allocation9], %s1948_s14, %s1948_s14, %s1949_s15  }
  0x2d   : > { %s1796_s26 = scalar_lea.vmem %s232_s12, 512  ;;  %p1804_p9 = scmp.lt.s32.totalorder %s232_s12, %s232_s12 }
  0x2e   : > { %p1797_p10 = scmp.ne.s32.totalorder %s232_s12, %s1796_s26  ;;  %p1805_p13 = scmp.lt.s32.totalorder %s1796_s26, %s1796_s26 }
  0x30   : > { %p1799_p7 = pnand %p1797_p10, %p1735_p12  ;;  %p1806_p4 = por %p1805_p13, %p1804_p9 }
  0x32   : > { %p1800_p1 = pneg %p1799_p7 }
  0x34   : > { %p1807_p2 = pnand %p1806_p4, %p1800_p1 }
  0x36   : > { %1810 = shalt.err (!%p1807_p2)
}
  0x37   : > { %1639 = dma.hbm_to_vmem [thread:$0]  (!%p2054_p11), %s2345_s4, 512, %s232_s12, [#allocation9], %s1948_s14, %s1948_s14, %s1949_s15  }
  0x38   : > { %s2085_s9 = sadd.s32 1, %s1943_s24   ;;  %s33_s8 = sadd.s32 1, %s1939_s23 }
  0x39   : > { %s30_s10 = ssub.s32 %s1943_s24, %s2085_s9  ;;  %p40_p6 = scmp.ne.s32.totalorder %s1939_s23, %s1935_s22 }
  0x3a   : > { %p31_p4 = scmp.eq.s32.totalorder %s30_s10, 0  ;;  %p41_p12 = scmp.eq.s32.totalorder %s1943_s24, 0 }
  0x3b   : > { %p1654_p0 = scmp.lt.s32.totalorder %s1943_s24, 2  ;;  %p2358_p3 = scmp.eq.s32.totalorder %s2026_s25, 1 }
  0x3c   : > { %s2095_s11 = scalar_select %p31_p4, %s1939_s23, %s33_s8  }
  0x3d   : > { %p42_p5 = por %p41_p12, %p40_p6  ;;  %p2099_p10 = por %p2358_p3, %p40_p6 }
  0x3e   : > { %s2104_s16 = sand.u32 1, %s1939_s23   ;;  %s1475_s12 = sshll.u32 %s1943_s24, 7 }
  0x3f   : > { %s2359_s13 = scalar_select %p2099_p10, 1, 0 }
  0x40   : > { %s1474_s14 = sshll.u32 %s2104_s16, 3  ;;  %s2111_s18 = scalar_lea.hbm %s2341_s0, %s1475_s12 }
  0x41   : > { %s252_s19 = scalar_lea.vmem [#allocation2], %s1474_s14  ;;  %p2113_p11 = pnand %p1654_p0, %p42_p5 }
  0x42   : > { %s259_s20 = sshll.u32 %s252_s19, 4  ;;  %s249_s7 = scalar_lea.sflag [#allocation3], %s2104_s16  ;;  %s260_s20 = int_to_ptr.vmem [resolvable:$true] %s259_s20 }
  0x43   : > { %s1811_s10 = scalar_lea.hbm %s2111_s18, 128  ;;  %p1813_p1 = pneg %p2113_p11 }
  0x44   : > { %p1812_p7 = scmp.ne.s32.totalorder %s2111_s18, %s1811_s10  ;;  %s1816_s14 = scalar_lea.hbm %s2341_s0, 256 }
  0x45   : > { %p1817_p2 = scmp.lt.s32.totalorder %s2111_s18, %s2341_s0  ;;  %p1818_p4 = scmp.lt.s32.totalorder %s1816_s14, %s1811_s10 }
  0x46   : > { %p1814_p9 = pnand %p1813_p1, %p1812_p7 }
  0x47   : > { %p1819_p6 = por %p1818_p4, %p1817_p2 }
  0x48   : > { %p1815_p13 = pneg %p1814_p9 }
  0x4a   : > { %p1820_p12 = pnand %p1819_p6, %p1815_p13 }
  0x4c   : > { %1823 = shalt.err (!%p1820_p12)
}
  0x4d   : > { %s1824_s19 = scalar_lea.vmem %s260_s20, 128  ;;  %s1950_s30 = smov [#allocation2]  }
  0x4e   : > { %p1825_p0 = scmp.ne.s32.totalorder %s260_s20, %s1824_s19  ;;  %s1829_s2 = sshll.u32 %s1950_s30, 4  ;;  %s1830_s2 = int_to_ptr.vmem [resolvable:$false] %s1829_s2 }
  0x4f   : > { %s1831_s8 = scalar_lea.vmem %s1830_s2, 256  ;;  %p1832_p7 = scmp.lt.s32.totalorder %s260_s20, %s1830_s2 }
  0x50   : > { %p1827_p5 = pnand %p1825_p0, %p1813_p1  ;;  %p1833_p9 = scmp.lt.s32.totalorder %s1831_s8, %s1824_s19 }
  0x52   : > { %p1828_p3 = pneg %p1827_p5  ;;  %p1834_p10 = por %p1833_p9, %p1832_p7 }
  0x54   : > { %p1835_p8 = pnand %p1834_p10, %p1828_p3 }
  0x56   : > { %1838 = shalt.err (!%p1835_p8)
}
  0x57   : > { %1643 = dma.hbm_to_vmem [thread:$0]  (!%p2113_p11), %s2111_s18, 128, %s260_s20, %s249_s7  }
  0x58   : > { %s1476_s10 = sshll.u32 %s1943_s24, 4  ;;  %s269_s2 = scalar_lea.vmem [#allocation5], %s2104_s16 }
  0x59   : > { %s2143_s30 = scalar_lea.hbm %s2342_s1, %s1476_s10  ;;  %s276_s15 = sshll.u32 %s269_s2, 4  ;;  %s277_s15 = int_to_ptr.vmem [resolvable:$true] %s276_s15 }
  0x5a   : > { %s2361_s17 = sand.u32 1, %s1943_s24   ;;  %s1839_s8 = scalar_lea.hbm %s2143_s30, 16 }
  0x5b   : > { %s267_s19 = scalar_lea.sflag [#allocation6], %s2361_s17  ;;  %p1840_p8 = scmp.ne.s32.totalorder %s2143_s30, %s1839_s8 }
  0x5c   : > { %s1844_s7 = scalar_lea.hbm %s2342_s1, 32  ;;  %p1845_p2 = scmp.lt.s32.totalorder %s2143_s30, %s2342_s1 }
  0x5d   : > { %p1842_p10 = pnand %p1840_p8, %p1813_p1  ;;  %p1846_p4 = scmp.lt.s32.totalorder %s1844_s7, %s1839_s8 }
  0x5f   : > { %p1843_p13 = pneg %p1842_p10  ;;  %p1847_p6 = por %p1846_p4, %p1845_p2 }
  0x61   : > { %p1848_p12 = pnand %p1847_p6, %p1843_p13 }
  0x63   : > { %1851 = shalt.err (!%p1848_p12)
}
  0x64   : > { %s1852_s16 = scalar_lea.vmem %s277_s15, 16  ;;  %s1951_s14 = smov [#allocation5]  }
  0x65   : > { %p1853_p0 = scmp.ne.s32.totalorder %s277_s15, %s1852_s16  ;;  %s1857_s2 = sshll.u32 %s1951_s14, 4  ;;  %s1858_s2 = int_to_ptr.vmem [resolvable:$false] %s1857_s2 }
  0x66   : > { %s1859_s17 = scalar_lea.vmem %s1858_s2, 32  ;;  %p1860_p7 = scmp.lt.s32.totalorder %s277_s15, %s1858_s2 }
  0x67   : > { %p1855_p5 = pnand %p1853_p0, %p1813_p1  ;;  %p1861_p9 = scmp.lt.s32.totalorder %s1859_s17, %s1852_s16 }
  0x69   : > { %p1856_p3 = pneg %p1855_p5  ;;  %p1862_p8 = por %p1861_p9, %p1860_p7 }
  0x6b   : > { %p1863_p10 = pnand %p1862_p8, %p1856_p3 }
  0x6d   : > { %1866 = shalt.err (!%p1863_p10)
}
  0x6e   : > { %1646 = dma.hbm_to_vmem [thread:$0]  (!%p2113_p11), %s2143_s30, 16, %s277_s15, %s267_s19  }
  0x6f   : > { %p2362_p13 = scmp.ne.s32.totalorder %s2355_s29, 0 }
  0x70   : > { %s2169_s8 = sand.u32 (!%p2362_p13), 1, %s1935_s22   ;;  %p2363_p1 = scmp.ne.s32.totalorder (!%p2362_p13), %s2353_s27, 0 }
  0x71   : > { %285 = sbr.rel (%p2362_p13) target bundleno = 2193 (0x891), region = 44  ;;  %s1478_s18 = sshll.u32 (!%p2362_p13), %s2169_s8, 3 }
  0x72   : > { %s288_s20 = scalar_lea.sflag (!%p2362_p13), [#allocation3], %s2169_s8  ;;  %s291_s7 = scalar_lea.vmem (!%p2362_p13), [#allocation2], %s1478_s18 }
  0x76   : > { %1910 = dma.done.wait (%p2363_p1), %s288_s20, 128  }
  0x77   : > { %1912 = vsyncadd (%p2363_p1), %s288_s20, 4294967168  ;;  %s296_s29 = sand.u32 1, %s2026_s25   ;;  %s299_s30 = scalar_lea.vmem [#allocation5], %s2169_s8 }
  0x78   : > { %s297_s26 = scalar_lea.sflag [#allocation6], %s296_s29 }
  0x79   : > { %1914 = dma.done.wait (%p2363_p1), %s297_s26, 16  }
  0x7a   : > { %1916 = vsyncadd (%p2363_p1), %s297_s26, 4294967280  ;;  %p2364_p11 = scmp.eq.s32.totalorder %s2026_s25, 0 }
  0x7c   : > { %1918 = dma.done.wait (%p2364_p11), [#allocation6], 512   ;;  %p2365_p2 = pmov %p2364_p11 }
  0x7e   : > { %1920 = vsyncadd (%p2365_p2), [#allocation6], 4294966784  ;;  %p2366_p4 = pmov %p2365_p2 }
  0x7f   : > { %p2367_p6 = pmov %p2365_p2 }
  0x80   : > { %1922 = dma.done.wait (%p2366_p4), [#allocation9], 1024  }
  0x81   : > { %1924 = vsyncadd (%p2367_p6), [#allocation9], 4294966272  ;;  %v1952_v0 = vmov 0.0   ;;  %vm1953_vm0 = vmmov 0   ;;  %v354_v1 = vld [vmem:[#allocation7 + $0x18] sm:$0xff]  ;;  %v353_v2 = vld [vmem:[#allocation7 + $0x10] sm:$0xff]  ;;  %v437_v17 = vlaneseq }
  0x82   : > { %1539 = vmatprep.subr.mxu0 %v1952_v0  ;;  %1547 = vmatprep.mubr.msk.f32.mxu0 %vm1953_vm0, %v1952_v0  ;;  %v352_v3 = vld [vmem:[#allocation7 + $0x8] sm:$0xff]  ;;  %v351_v4 = vld [vmem:[#allocation7] sm:$0xff]  ;;  %vm359_vm1 = vcmask 261120   ;;  %s1954_s19 = smov 120   ;;  %s1955_s10 = smov 96   ;;  %vm445_vm2 = vcmask 64512  }
  0x83   : > { %1550 = vmatprep.subr.mxu1 %v1952_v0  ;;  %1552 = vmatprep.mubr.msk.f32.mxu1 %vm1953_vm0, %v1952_v0  ;;  %v2201_v5 = vld [vmem:[%s291_s7] sm:$0xff]  ;;  %s1956_s12 = smov 80   ;;  %s1957_s16 = smov 88   ;;  %v438_v19 = vshrl.u32 %v437_v17, 7  ;;  %v1961_v21 = vmov -1e+30  }
  0x84   : > { %1540 = vmatpush3.msra.mxu0 %v354_v1  ;;  %v1483_v6 = vld [vmem:[%s2346_s5] ss:$0 sm:$0xff]  ;;  %s1958_s14 = smov 72   ;;  %s1959_s2 = smov 112   ;;  %vm1119_vm4 = vcmask 130048   ;;  %vm1121_vm5 = vcmask 195584  }
  0x85   : > { %1541 = vmatprep.subr.mxu0 %v1952_v0  ;;  %s1960_s17 = smov 104   ;;  %v433_v18 = vld [vmem:[%s299_s30] sm:$0x1]  ;;  %v439_v20 = vsub.s32 0, %v438_v19  ;;  %s1962_s20 = smov 56  }
  0x86   : > { %1542 = vmatpush3.msra.mxu0 %v353_v2  ;;  %vm434_vm3 = vcmp.gt.f32.partialorder %v433_v18, 0.0  ;;  %s1963_s7 = smov 64   ;;  %s1964_s29 = smov 40   ;;  %v1123_v18 = vld [vmem:[#allocation8] sm:$0xff] }
  0x87   : > { %1543 = vmatprep.subr.mxu0 %v1952_v0  ;;  %v435_v22 = vsel %vm434_vm3, 0.0, %v1961_v21  ;;  %s1965_s26 = smov 48   ;;  %s1966_s30 = smov 8  }
  0x88   : > { %1544 = vmatpush3.msra.mxu0 %v352_v3  ;;  %v440_v23 = vrot.slane %v435_v22, %v439_v20  ;;  %s1967_s27 = smov 16   ;;  %s1968_s15 = smov 24  }
  0x89   : > { %1545 = vmatprep.subr.mxu0 %v1952_v0  ;;  %p2368_p0 = scmp.ne.s32.totalorder %s2359_s13, 0 }
  0x8a   : > { %1546 = vmatpush3.msra.mxu0 %v351_v4 }
  0x8b   : > { %1548 = vmatmul.mubr.msk.f32.vlgmr.msra.gmra.mxu0 %vm359_vm1, %v2201_v5  ;;  %1560 = vmatprep.subr.mxu0 %v1952_v0 }
  0x8c   : > { %1562 = vmatprep.mubr.msk.f32.mxu0 %vm1953_vm0, %v1952_v0 }
 0x14b   : > { %v429_v7 = vpop.f32.mrf.mxu0 }
 0x14c   : > { %v2212_v8 = vadd.f32 %v1483_v6, %v429_v7 }
 0x14d   : > { %v1549_v9 = vpop.f32.mrf.mxu0 }
 0x14e   : > { %608 = vrot.lane.b32.xlu1 %v2212_v8, %s1954_s19  ;;  %443 = vrot.lane.b32.xlu0 %v2212_v8, %s1955_s10 }
 0x152   : > { %776 = vrot.lane.b32.xlu1 %v2212_v8, %s1956_s12  ;;  %610 = vrot.lane.b32.xlu0 %v2212_v8, %s1957_s16 }
 0x156   : > { %942 = vrot.lane.b32.xlu1 %v2212_v8, %s1958_s14  ;;  %774 = vrot.lane.b32.xlu0 %v2212_v8, %s1959_s2  ;;  %s1969_s14 = smov [#allocation11]  }
 0x15a   : > { %940 = vrot.lane.b32.xlu0 %v2212_v8, %s1960_s17 }
 0x1c0   : > { %v609_v10 = vpop.permute.xlu1 %608  ;;  %v444_v11 = vpop.permute.xlu0 %443 }
 0x1c1   : > { %1551 = vmatpush3.xpose.msk.msra.mxu1 %vm445_vm2, %v444_v11  ;;  %v1125_v11 = vld [vmem:[#allocation8 + $0x10] sm:$0xff] }
 0x1c2   : > { %1555 = vmatprep.subr.mxu1 %v1952_v0 }
 0x1c4   : > { %1553 = vmatmul.mubr.msk.f32.vlgmr.msra.gmra.mxu1 %vm445_vm2, %v2212_v8  ;;  %v611_v12 = vpop.permute.xlu0 %610  ;;  %v777_v13 = vpop.permute.xlu1 %776 }
 0x1c5   : > { %1561 = vmatpush3.xpose.msk.msra.mxu0 %vm445_vm2, %v611_v12  ;;  %1557 = vmatprep.mubr.msk.f32.mxu1 %vm1953_vm0, %v1952_v0  ;;  %v1124_v12 = vld [vmem:[#allocation8 + $0x8] sm:$0xff] }
 0x1c6   : > { %1570 = vmatprep.subr.mxu0 %v1952_v0 }
 0x1c8   : > { %1563 = vmatmul.mubr.msk.f32.vlgmr.msra.gmra.mxu0 %vm445_vm2, %v609_v10  ;;  %v775_v14 = vpop.permute.xlu0 %774  ;;  %v943_v15 = vpop.permute.xlu1 %942  ;;  %v1126_v10 = vld [vmem:[#allocation8 + $0x18] sm:$0xff] }
 0x1c9   : > { %1571 = vmatpush3.xpose.msk.msra.mxu0 %vm445_vm2, %v777_v13  ;;  %1572 = vmatprep.mubr.msk.f32.mxu0 %vm1953_vm0, %v1952_v0 }
 0x1ca   : > { %1580 = vmatprep.subr.mxu0 %v1952_v0 }
 0x1cc   : > { %1573 = vmatmul.mubr.msk.f32.vlgmr.msra.gmra.mxu0 %vm445_vm2, %v775_v14  ;;  %v941_v16 = vpop.permute.xlu0 %940 }
 0x1cd   : > { %1581 = vmatpush3.xpose.msk.msra.mxu0 %vm445_vm2, %v943_v15  ;;  %1582 = vmatprep.mubr.msk.f32.mxu0 %vm1953_vm0, %v1952_v0 }
 0x1ce   : > { %1590 = vmatprep.subr.mxu0 %v1952_v0 }
 0x1d0   : > { %1583 = vmatmul.mubr.msk.f32.vlgmr.msra.gmra.mxu0 %vm445_vm2, %v941_v16 }
 0x1d1   : > { %1598 = vmatprep.mubr.msk.f32.mxu0 %vm1953_vm0, %v1952_v0  ;;  %1591 = vmatpush3.msra.mxu0 %v1126_v10  ;;  %v1503_v10 = vld [vmem:[%s2346_s5 + $0x5] ss:$0 sm:$0xff] }
 0x1d2   : > { %1592 = vmatprep.subr.mxu0 %v1952_v0 }
 0x1d3   : > { %1593 = vmatpush3.msra.mxu0 %v1125_v11 }
 0x1d4   : > { %1594 = vmatprep.subr.mxu0 %v1952_v0 }
 0x1d5   : > { %1595 = vmatpush3.msra.mxu0 %v1124_v12 }
 0x1d6   : > { %1596 = vmatprep.subr.mxu0 %v1952_v0 }
 0x1d7   : > { %1597 = vmatpush3.msra.mxu0 %v1123_v18 }
 0x284   : > { %v516_v24 = vpop.f32.mrf.mxu1 }
 0x285   : > { %v517_v25 = vadd.f32 %v516_v24, %v440_v23 }
 0x286   : > { %v1554_v26 = vpop.f32.mrf.mxu1 }
 0x287   : > { %v520_v27 = vsel %vm445_vm2, %v517_v25, -inf }
 0x288   : > { %521 = vmax.xlane.f32.xlu1 %v520_v27  ;;  %v682_v28 = vpop.f32.mrf.mxu0 }
 0x289   : > { %v683_v29 = vadd.f32 %v682_v28, %v440_v23 }
 0x28a   : > { %v1564_v30 = vpop.f32.mrf.mxu0 }
 0x28b   : > { %v686_v31 = vsel %vm445_vm2, %v683_v29, -inf }
 0x28c   : > { %687 = vmax.xlane.f32.xlu0 %v686_v31  ;;  %v848_v32 = vpop.f32.mrf.mxu0 }
 0x28d   : > { %v849_v33 = vadd.f32 %v848_v32, %v440_v23  ;;  %v1497_v32 = vld [vmem:[%s2346_s5 + $0x1] ss:$0 sm:$0xff] }
 0x28e   : > { %v1574_v34 = vpop.f32.mrf.mxu0 }
 0x28f   : > { %v852_v35 = vsel %vm445_vm2, %v849_v33, -inf }
 0x290   : > { %853 = vmax.xlane.f32.xlu0 %v852_v35  ;;  %v1014_v36 = vpop.f32.mrf.mxu0 }
 0x291   : > { %v1015_v38 = vadd.f32 %v1014_v36, %v440_v23 }
 0x292   : > { %v1584_v37 = vpop.f32.mrf.mxu0 }
 0x293   : > { %v1018_v39 = vsel %vm445_vm2, %v1015_v38, -inf }
 0x299   : > { %695 = vrot.lane.b32.xlu1 %v2212_v8, %s1962_s20 }
 0x2a6   : > { %529 = vrot.lane.b32.xlu0 %v2212_v8, %s1963_s7 }
 0x2aa   : > { %1027 = vrot.lane.b32.xlu0 %v2212_v8, %s1964_s29 }
 0x2bd   : > { %1019 = vmax.xlane.f32.xlu1 %v1018_v39 }
 0x2ce   : > { %861 = vrot.lane.b32.xlu1 %v2212_v8, %s1965_s26  ;;  %s1505_s26 = sshll.u32 %s2026_s25, 7  ;;  %s1871_s25 = sshll.u32 %s1969_s14, 4  ;;  %s1872_s25 = int_to_ptr.vmem [resolvable:$false] %s1871_s25 }
 0x2cf   : > { %s1348_s12 = scalar_lea.hbm %s2347_s6, %s1505_s26 }
 0x311   : > { %v522_v40 = vpop.xlane.xlu1 %521 }
 0x312   : > { %v523_v41 = vsub.f32 %v517_v25, %v522_v40 }
 0x314   : > { %v524_v42 = vmul.f32 1.442695, %v523_v41 }
 0x315   : > { %v688_v43 = vpop.xlane.xlu0 %687  ;;  %v696_v51 = vpop.permute.xlu1 %695 }
 0x316   : > { %1713 = vpow2.f32 %v524_v42  ;;  %v689_v44 = vsub.f32 %v683_v29, %v688_v43  ;;  %v1232_v43 = vld [vmem:[#allocation10 + $0x18] sm:$0xff] }
 0x318   : > { %v690_v45 = vmul.f32 1.442695, %v689_v44  ;;  %v1231_v44 = vld [vmem:[#allocation10 + $0x10] sm:$0xff] }
 0x319   : > { %v854_v46 = vpop.xlane.xlu0 %853 }
 0x31a   : > { %1715 = vpow2.f32 %v690_v45  ;;  %v855_v47 = vsub.f32 %v849_v33, %v854_v46  ;;  %v1230_v45 = vld [vmem:[#allocation10 + $0x8] sm:$0xff] }
 0x31c   : > { %v856_v48 = vmul.f32 1.442695, %v855_v47 }
 0x31d   : > { %v530_v49 = vpop.permute.xlu0 %529 }
 0x31e   : > { %1717 = vpow2.f32 %v856_v48  ;;  %1556 = vmatpush3.msra.mxu1 %v530_v49 }
 0x31f   : > { %1565 = vmatprep.subr.mxu1 %v1952_v0 }
 0x321   : > { %v1028_v61 = vpop.permute.xlu0 %1027 }
 0x323   : > { %v1714_v50 = vpop.eup %1713 }
 0x324   : > { %1558 = vmatmul.mubr.msk.f32.vlgmr.msra.gmra.mxu1 %vm445_vm2, %v1714_v50  ;;  %v526_v56 = vsel %vm445_vm2, %v1714_v50, 0.0  ;;  %v1499_v50 = vld [vmem:[%s2346_s5 + $0x2] ss:$0 sm:$0xff] }
 0x325   : > { %1566 = vmatpush3.msra.mxu1 %v696_v51  ;;  %1567 = vmatprep.mubr.msk.f32.mxu1 %vm1953_vm0, %v1952_v0 }
 0x326   : > { %1575 = vmatprep.subr.mxu1 %v1952_v0 }
 0x327   : > { %v1716_v52 = vpop.eup %1715 }
 0x328   : > { %1568 = vmatmul.mubr.msk.f32.vlgmr.msra.gmra.mxu1 %vm445_vm2, %v1716_v52  ;;  %v692_v53 = vsel %vm445_vm2, %v1716_v52, 0.0  ;;  %v1500_v52 = vld [vmem:[%s2346_s5 + $0x3] ss:$0 sm:$0xff] }
 0x329   : > { %693 = vadd.xlane.f32.xlu1 %v692_v53  ;;  %1577 = vmatprep.mubr.msk.f32.mxu1 %vm1953_vm0, %v1952_v0 }
 0x32b   : > { %v1718_v54 = vpop.eup %1717 }
 0x32c   : > { %v858_v55 = vsel %vm445_vm2, %v1718_v54, 0.0 }
 0x32d   : > { %859 = vadd.xlane.f32.xlu0 %v858_v55  ;;  %527 = vadd.xlane.f32.xlu1 %v526_v56 }
 0x346   : > { %v1020_v57 = vpop.xlane.xlu1 %1019 }
 0x347   : > { %v1021_v58 = vsub.f32 %v1015_v38, %v1020_v57 }
 0x349   : > { %v1022_v59 = vmul.f32 1.442695, %v1021_v58 }
 0x34a   : > { %v862_v60 = vpop.permute.xlu1 %861 }
 0x34b   : > { %1719 = vpow2.f32 %v1022_v59  ;;  %1576 = vmatpush3.msra.mxu1 %v862_v60 }
 0x34c   : > { %1578 = vmatmul.mubr.msk.f32.vlgmr.msra.gmra.mxu1 %vm445_vm2, %v1718_v54  ;;  %1585 = vmatprep.subr.mxu1 %v1952_v0 }
 0x34d   : > { %1586 = vmatpush3.msra.mxu1 %v1028_v61  ;;  %1587 = vmatprep.mubr.msk.f32.mxu1 %vm1953_vm0, %v1952_v0 }
 0x34e   : > { %1601 = vmatprep.subr.mxu1 %v1952_v0 }
 0x358   : > { %v1720_v62 = vpop.eup %1719 }
 0x359   : > { %1588 = vmatmul.mubr.msk.f32.vlgmr.msra.gmra.mxu1 %vm445_vm2, %v1720_v62  ;;  %v1024_v63 = vsel %vm445_vm2, %v1720_v62, 0.0 }
 0x35a   : > { %1025 = vadd.xlane.f32.xlu0 %v1024_v63  ;;  %1609 = vmatprep.mubr.msk.f32.mxu1 %vm1953_vm0, %v1952_v0 }
 0x35b   : > { %1602 = vmatpush3.msra.mxu1 %v1232_v43 }
 0x35c   : > { %1603 = vmatprep.subr.mxu1 %v1952_v0 }
 0x35d   : > { %1604 = vmatpush3.msra.mxu1 %v1231_v44 }
 0x35e   : > { %1605 = vmatprep.subr.mxu1 %v1952_v0 }
 0x35f   : > { %1606 = vmatpush3.msra.mxu1 %v1230_v45 }
 0x360   : > { %1607 = vmatprep.subr.mxu1 %v1952_v0 }
 0x3b2   : > { %v694_v1 = vpop.xlane.xlu1 %693 }
 0x3b3   : > { %1721 = vrcp.f32 %v694_v1 }
 0x3b6   : > { %v860_v9 = vpop.xlane.xlu0 %859  ;;  %v528_v23 = vpop.xlane.xlu1 %527 }
 0x3b7   : > { %1723 = vrcp.f32 %v860_v9 }
 0x3c0   : > { %v1722_v4 = vpop.eup %1721 }
 0x3c4   : > { %v1724_v14 = vpop.eup %1723 }
 0x3e3   : > { %v1026_v13 = vpop.xlane.xlu0 %1025 }
 0x3e4   : > { %v601_v2 = vpop.f32.mrf.mxu1  ;;  %1725 = vrcp.f32 %v1026_v13 }
 0x3e5   : > { %1727 = vrcp.f32 %v528_v23 }
 0x3e6   : > { %v1559_v3 = vpop.f32.mrf.mxu1 }
 0x3e8   : > { %v767_v6 = vpop.f32.mrf.mxu1 }
 0x3e9   : > { %v773_v7 = vmul.f32 %v1722_v4, %v767_v6 }
 0x3ea   : > { %v1569_v8 = vpop.f32.mrf.mxu1 }
 0x3eb   : > { %1107 = vrot.lane.b32.xlu0 %v773_v7, %s1966_s30  ;;  %v1502_v8 = vld [vmem:[%s2346_s5 + $0x4] ss:$0 sm:$0xff]  ;;  %s343_s30 = scalar_lea.vmem [#allocation11], %s1478_s18  ;;  %s1873_s18 = scalar_lea.vmem %s1872_s25, 256 }
 0x3f1   : > { %v1726_v19 = vpop.eup %1725 }
 0x3f2   : > { %v1728_v24 = vpop.eup %1727 }
 0x3f3   : > { %v607_v27 = vmul.f32 %v1728_v24, %v601_v2 }
 0x40c   : > { %v933_v15 = vpop.f32.mrf.mxu1 }
 0x40d   : > { %v939_v16 = vmul.f32 %v1724_v14, %v933_v15 }
 0x40e   : > { %v1579_v17 = vpop.f32.mrf.mxu1 }
 0x40f   : > { %1111 = vrot.lane.b32.xlu1 %v939_v16, %s1967_s27  ;;  %s1350_s27 = sshll.u32 %s343_s30, 4  ;;  %s1351_s27 = int_to_ptr.vmem [resolvable:$true] %s1350_s27 }
 0x410   : > { %s1867_s16 = scalar_lea.vmem %s1351_s27, 128  ;;  %p1874_p7 = scmp.lt.s32.totalorder %s1351_s27, %s1872_s25 }
 0x411   : > { %p1868_p12 = scmp.ne.s32.totalorder %s1351_s27, %s1867_s16  ;;  %p1875_p9 = scmp.lt.s32.totalorder %s1873_s18, %s1867_s16 }
 0x413   : > { %p1869_p5 = pnand %p1868_p12, %p2368_p0  ;;  %p1876_p8 = por %p1875_p9, %p1874_p7 }
 0x415   : > { %p1870_p3 = pneg %p1869_p5 }
 0x417   : > { %p1877_p10 = pnand %p1876_p8, %p1870_p3 }
 0x419   : > { %v1099_v20 = vpop.f32.mrf.mxu1 }
 0x41a   : > { %v1105_v21 = vmul.f32 %v1726_v19, %v1099_v20 }
 0x41b   : > { %v1589_v22 = vpop.f32.mrf.mxu1 }
 0x41c   : > { %1115 = vrot.lane.b32.xlu1 %v1105_v21, %s1968_s15 }
 0x45d   : > { %v1108_v25 = vpop.permute.xlu0 %1107 }
 0x45e   : > { %v1118_v28 = vsel %vm445_vm2, %v607_v27, %v1108_v25 }
 0x481   : > { %v1112_v26 = vpop.permute.xlu1 %1111 }
 0x482   : > { %v1120_v29 = vsel %vm1119_vm4, %v1118_v28, %v1112_v26 }
 0x48e   : > { %v1116_v30 = vpop.permute.xlu1 %1115 }
 0x48f   : > { %v1122_v31 = vsel %vm1121_vm5, %v1120_v29, %v1116_v30 }
 0x490   : > { %1599 = vmatmul.mubr.msk.f32.vlgmr.msra.gmra.mxu0 %vm359_vm1, %v1122_v31 }
 0x550   : > { %v1200_v33 = vpop.f32.mrf.mxu0 }
 0x551   : > { %v1201_v34 = vadd.f32 %v1497_v32, %v1200_v33 }
 0x552   : > { %v1600_v35 = vpop.f32.mrf.mxu0 }
 0x553   : > { %v1204_v36 = vadd.f32 %v1201_v34, %v2201_v5  ;;  %v1229_v5 = vld [vmem:[#allocation10] sm:$0xff] }
 0x554   : > { %1608 = vmatpush3.msra.mxu1 %v1229_v5 }
 0x555   : > { %v1205_v37 = vsel %vm359_vm1, %v1204_v36, 0.0 }
 0x556   : > { %1206 = vadd.xlane.f32.xlu0 %v1205_v37 }
 0x56c   : > { %1234 = vrot.lane.b32.xlu0 %v1497_v32, %s1955_s10  ;;  %s1337_s10 = scalar_lea.sflag [#allocation4], %s2169_s8 }
 0x5df   : > { %v1207_v38 = vpop.xlane.xlu0 %1206 }
 0x5e0   : > { %v1209_v39 = vmul.f32 0.03125, %v1207_v38 }
 0x5e2   : > { %v1210_v40 = vsub.f32 %v1204_v36, %v1209_v39 }
 0x5e3   : > { %v1235_v0 = vpop.permute.xlu0 %1234 }
 0x5e4   : > { %v1211_v41 = vmul.f32 %v1210_v40, %v1210_v40 }
 0x5e6   : > { %v1212_v42 = vsel %vm359_vm1, %v1211_v41, 0.0 }
 0x5e7   : > { %1213 = vadd.xlane.f32.xlu1 %v1212_v42 }
 0x670   : > { %v1214_v46 = vpop.xlane.xlu1 %1213 }
 0x671   : > { %v1215_v47 = vmul.f32 0.03125, %v1214_v46 }
 0x673   : > { %v1216_v48 = vadd.f32 1e-05, %v1215_v47 }
 0x675   : > { %1729 = vrsqrt.f32 %v1216_v48 }
 0x682   : > { %v1730_v49 = vpop.eup %1729 }
 0x683   : > { %v1218_v51 = vmul.f32 %v1730_v49, %v1210_v40 }
 0x685   : > { %v1223_v53 = vmul.f32 %v1499_v50, %v1218_v51 }
 0x687   : > { %v1228_v54 = vadd.f32 %v1500_v52, %v1223_v53 }
 0x689   : > { %1610 = vmatmul.mubr.msk.f32.vlgmr.msra.gmra.mxu1 %vm359_vm1, %v1228_v54 }
 0x749   : > { %v1306_v55 = vpop.f32.mrf.mxu1 }
 0x74a   : > { %v1307_v56 = vadd.f32 %v1306_v55, %v1235_v0 }
 0x74b   : > { %v1611_v57 = vpop.f32.mrf.mxu1 }
 0x74c   : > { %v1310_v58 = vmax.f32 %v1307_v56, 0.0 }
 0x74e   : > { %v1311_v59 = vadd.f32 %v1310_v58, %v1228_v54 }
 0x750   : > { %v1312_v60 = vsel %vm359_vm1, %v1311_v59, 0.0 }
 0x751   : > { %1313 = vadd.xlane.f32.xlu1 %v1312_v60 }
 0x7da   : > { %v1314_v61 = vpop.xlane.xlu1 %1313 }
 0x7db   : > { %v1315_v62 = vmul.f32 0.03125, %v1314_v61 }
 0x7dd   : > { %v1316_v63 = vsub.f32 %v1311_v59, %v1315_v62 }
 0x7df   : > { %v1317_v1 = vmul.f32 %v1316_v63, %v1316_v63 }
 0x7e1   : > { %v1318_v2 = vsel %vm359_vm1, %v1317_v1, 0.0 }
 0x7e2   : > { %1319 = vadd.xlane.f32.xlu1 %v1318_v2 }
 0x86b   : > { %v1320_v3 = vpop.xlane.xlu1 %1319 }
 0x86c   : > { %v1321_v4 = vmul.f32 0.03125, %v1320_v3 }
 0x86e   : > { %v1322_v6 = vadd.f32 1e-05, %v1321_v4 }
 0x870   : > { %1731 = vrsqrt.f32 %v1322_v6 }
 0x87d   : > { %v1732_v7 = vpop.eup %1731 }
 0x87e   : > { %v1324_v9 = vmul.f32 %v1732_v7, %v1316_v63 }
 0x880   : > { %v1329_v11 = vmul.f32 %v1502_v8, %v1324_v9 }
 0x882   : > { %v1334_v12 = vadd.f32 %v1503_v10, %v1329_v11 }
 0x884   : > { %1335 = vst.msk [vmem:[%s343_s30] sm:$0xff] %vm359_vm1, %v1334_v12 }
 0x885   : > { %1880 = shalt.err (!%p1877_p10)
}
 0x886   : > { %s1881_s2 = scalar_lea.hbm %s1348_s12, 128  ;;  %s1885_s20 = scalar_lea.hbm %s2347_s6, 256 }
 0x887   : > { %p1882_p13 = scmp.ne.s32.totalorder %s1348_s12, %s1881_s2  ;;  %p1886_p2 = scmp.lt.s32.totalorder %s1348_s12, %s2347_s6 }
 0x888   : > { %p1887_p4 = scmp.lt.s32.totalorder %s1885_s20, %s1881_s2 }
 0x889   : > { %p1883_p1 = pnand %p1882_p13, %p2368_p0 }
 0x88a   : > { %p1888_p6 = por %p1887_p4, %p1886_p2 }
 0x88b   : > { %p1884_p11 = pneg %p1883_p1 }
 0x88d   : > { %p1889_p12 = pnand %p1888_p6, %p1884_p11 }
 0x88f   : > { %1892 = shalt.err (!%p1889_p12)
}
 0x890   : > { %1628 = dma.vmem_to_hbm [thread:$0]  (%p2368_p0), %s1351_s27, 128, %s1348_s12, %s1337_s10  }
 0x891 PF: > { %s1362_s26 = sand.u32 1, %s1931_s21   ;;  %p2369_p5 = scmp.ne.s32.totalorder %s2354_s28, 0 }
 0x892   : > { %p2370_p3 = scmp.ge.s32.totalorder %s1943_s24, 2  ;;  %s1363_s30 = scalar_lea.sflag [#allocation4], %s1362_s26 }
 0x894   : > { %p1648_p7 = pnand %p2370_p3, %p2369_p5 }
 0x896   : > { %p1649_p9 = pneg %p1648_p7 }
 0x898   : > { %1926 = dma.done.wait (%p1649_p9), %s1363_s30, 128  }
 0x899   : > { %1928 = vsyncadd (%p1649_p9), %s1363_s30, 4294967168  ;;  %p23_p8 = scmp.ge.s32.totalorder %s2085_s9, 4   ;;  %s2371_s21 = smov %s1935_s22 }
 0x89a   : > { %s2372_s22 = smov %s1939_s23  ;;  %s2373_s23 = smov %s2095_s11 }
 0x89b   : > { %s2374_s24 = smov %s2085_s9  ;;  %25 = sbr.rel (!%p23_p8) target bundleno = 10 (0xa), region = 114 }
 0x8a0   :  { %1368 = vsyncpa [#allocation3], 1 }
 0x8a1   :  { %1370 = vsyncpa [#allocation3 + $0x1], 1 }
 0x8a2   :  { %1371 = vsyncpa [#allocation6], 1 }
 0x8a3   :  { %1373 = vsyncpa [#allocation6 + $0x1], 1 }
 0x8a4   :  { %1374 = vsyncpa [#allocation9], 1 }
 0x8a5   :  { %1375 = vsyncpa [#allocation4], 1 }
 0x8a6   :  { %1377 = vsyncpa [#allocation4 + $0x1], 1 }

</bundles_post_ra>
